<compile_context>
chip_gen: v5e
topology: v5e:2x2
jax: 0.10.0
libtpu: 0.0.40
codegen_flags: <defaults>
</compile_context>

<pallas_src>
import jax
import jax.numpy as jnp
from jax.experimental import pallas as pl
from jax.experimental.pallas import tpu as pltpu

LANE = 128            # TPU lane width
SUBLANE = 8           # f32 sublane tile
MAX_ROW_TILE = 4096   # upper cap on the row tile (per review: 2048-4096)
TARGET_GRID_STEPS = 8 # >= ~4 steps per TensorCore on v7x when rows allow


# ----------------------------- Pallas kernel -------------------------------

def _fused_seq2seq_kernel(x_ref, ew1_ref, eb1_ref, ew2_ref, eb2_ref,
                          sw1_ref, sb1_ref, sw2_ref, sb2_ref, o_ref):
    """One row tile: epoch MLP (ReLU) + sequence MLP (tanh), all in VMEM."""
    wdt = ew1_ref.dtype                       # matmul operand dtype (bf16 / f32)
    x = x_ref[...].astype(wdt)                # in-kernel cast: no wrapper HBM pass

    # epoch_encoder: Linear -> ReLU -> Linear   (f32 accumulation, f32 bias add)
    h = jnp.dot(x, ew1_ref[...], preferred_element_type=jnp.float32)
    h = jnp.maximum(h + eb1_ref[...], 0.0).astype(wdt)
    e = (jnp.dot(h, ew2_ref[...], preferred_element_type=jnp.float32)
         + eb2_ref[...]).astype(wdt)

    # sequence_encoder: Linear -> tanh -> Linear (per-step == per-row)
    h2 = jnp.dot(e, sw1_ref[...], preferred_element_type=jnp.float32)
    h2 = jnp.tanh(h2 + sb1_ref[...]).astype(wdt)          # tanh in f32 (EUP)
    o = jnp.dot(h2, sw2_ref[...], preferred_element_type=jnp.float32) + sb2_ref[...]

    o_ref[...] = o.astype(o_ref.dtype)        # lane-dense (128-wide) store


# ------------------------------ host helpers -------------------------------

def _round_up(n, m):
    return ((n + m - 1) // m) * m


def _pad2d(a, rows, cols, dtype):
    a = a.astype(dtype)
    return jnp.pad(a, ((0, rows - a.shape[0]), (0, cols - a.shape[1])))


def _physical_vmem_bytes():
    """Generation-aware VMEM size; conservative fallback = v7x (64 MiB / TC)."""
    try:
        info = pltpu.get_tpu_info()
        for attr in ("vmem_capacity_bytes", "vmem_bytes"):
            v = getattr(info, attr, None)
            if v:
                return int(v)
    except Exception:
        pass
    return 64 * 1024 * 1024


def _choose_row_tile(rows, per_row_bytes, budget_bytes):
    """Biggest tile the VMEM budget allows, capped, keeping several grid steps."""
    cap = max(SUBLANE, budget_bytes // per_row_bytes)
    cap = min(cap, MAX_ROW_TILE)
    want = max(SUBLANE, rows // TARGET_GRID_STEPS)   # >= ~8 steps when rows allow
    tile = min(cap, want)
    align = LANE if tile >= LANE else SUBLANE
    return max(align, (tile // align) * align)


# --------------------------- SeqtoSeq forward ------------------------------

def seq_to_seq_forward(x, params, *, compute_dtype=jnp.bfloat16,
                       out_dtype=jnp.bfloat16):
    """Mirrors SeqtoSeqModule.forward.

    x: (B, L, C, T)  ->  (B, L, NUM_CLASSES) in `out_dtype`.
    compute_dtype: matmul-operand dtype (accumulation is always f32).
      bf16 default (v6e/v7x native MXU, halves logits writeback); pass
      compute_dtype=out_dtype=jnp.float32 for an exact f32 path.
    x may already be bf16 upstream, which additionally halves the input DMA.
    """
    B, L = x.shape[0], x.shape[1]
    x2d = x.reshape(B * L, -1)                      # metadata-only reshape
    rows, f_in = x2d.shape
    num_classes = params["sw2"].shape[1]

    # ---- zero-pad weight/bias minor dims to 128 lanes (exact: relu(0)=tanh(0)=0) ----
    h1p = _round_up(params["ew1"].shape[1], LANE)
    e_p = _round_up(params["ew2"].shape[1], LANE)
    h2p = _round_up(params["sw1"].shape[1], LANE)
    c_p = _round_up(num_classes, LANE)

    ew1 = _pad2d(params["ew1"], f_in, h1p, compute_dtype)
    eb1 = _pad2d(params["eb1"], 1, h1p, jnp.float32)
    ew2 = _pad2d(params["ew2"], h1p, e_p, compute_dtype)
    eb2 = _pad2d(params["eb2"], 1, e_p, jnp.float32)
    sw1 = _pad2d(params["sw1"], e_p, h2p, compute_dtype)
    sb1 = _pad2d(params["sb1"], 1, h2p, jnp.float32)
    sw2 = _pad2d(params["sw2"], h2p, c_p, compute_dtype)
    sb2 = _pad2d(params["sb2"], 1, c_p, jnp.float32)

    x_isz = jnp.dtype(x2d.dtype).itemsize
    w_isz = jnp.dtype(compute_dtype).itemsize
    o_isz = jnp.dtype(out_dtype).itemsize

    # ---- generation-aware VMEM budget & row tile ----
    phys = _physical_vmem_bytes()                         # 64 MiB v7x, 128 MiB v5e/v6e
    vmem_limit = int(min(phys * 3 // 4, 100 * 1024 * 1024))

    weight_bytes = 2 * ((f_in * h1p + h1p * e_p + e_p * h2p + h2p * c_p) * w_isz
                        + (h1p + e_p + h2p + c_p) * 4)    # x2 for double buffers
    per_row_bytes = (2 * f_in * x_isz                     # double-buffered x block
                     + 2 * c_p * o_isz                    # double-buffered out block
                     + (h1p + e_p + h2p + c_p) * 4        # f32 accumulators
                     + (h1p + e_p + h2p) * w_isz)         # cast matmul operands
    tile_budget = max(int(vmem_limit * 0.7) - weight_bytes,
                      per_row_bytes * SUBLANE)
    row_tile = _choose_row_tile(rows, per_row_bytes, tile_budget)
    grid_rows = pl.cdiv(rows, row_tile)                   # tail block OOB-masked

    flops = 2 * rows * (f_in * h1p + h1p * e_p + e_p * h2p + h2p * c_p)
    cost = pl.CostEstimate(
        flops=int(flops),
        transcendentals=int(rows * h2p),
        bytes_accessed=int(rows * (f_in * x_isz + c_p * o_isz) + weight_bytes),
    )

    const = lambda i: (0, 0)   # weights/biases: same block every step -> VMEM-resident

    out = pl.pallas_call(
        _fused_seq2seq_kernel,
        out_shape=jax.ShapeDtypeStruct((rows, c_p), out_dtype),
        grid_spec=pltpu.PrefetchScalarGridSpec(
            num_scalar_prefetch=0,
            grid=(grid_rows,),
            in_specs=[
                pl.BlockSpec((row_tile, f_in), lambda i: (i, 0)),   # x rows
                pl.BlockSpec((f_in, h1p), const),                   # ew1
                pl.BlockSpec((1, h1p), const),                      # eb1
                pl.BlockSpec((h1p, e_p), const),                    # ew2
                pl.BlockSpec((1, e_p), const),                      # eb2
                pl.BlockSpec((e_p, h2p), const),                    # sw1
                pl.BlockSpec((1, h2p), const),                      # sb1
                pl.BlockSpec((h2p, c_p), const),                    # sw2
                pl.BlockSpec((1, c_p), const),                      # sb2
            ],
            out_specs=pl.BlockSpec((row_tile, c_p), lambda i: (i, 0)),
        ),
        compiler_params=pltpu.CompilerParams(
            dimension_semantics=("parallel",),
            vmem_limit_bytes=vmem_limit,
        ),
        cost_estimate=cost,
    )(x2d, ew1, eb1, ew2, eb2, sw1, sb1, sw2, sb2)

    # TODO(synk): in a full pipeline, fuse this slice into the consumer (loss/argmax)
    # so the padded logits buffer is read only once.
    return out[:, :num_classes].reshape(B, L, num_classes)


# -------------------------------- main --------------------------------------

def _reference(x, params, B, L, num_classes):
    x2d = x.reshape(B * L, -1)
    r = jnp.maximum(x2d @ params["ew1"] + params["eb1"], 0.0) @ params["ew2"] + params["eb2"]
    r = jnp.tanh(r @ params["sw1"] + params["sb1"]) @ params["sw2"] + params["sb2"]
    return r.reshape(B, L, num_classes)


if __name__ == "__main__":
    B, L, C, T = 2, 8, 4, 16          # batch, sequence length, channels, samples
    F_IN = C * T                      # 64 per-epoch flattened features
    H = 32                            # hidden width
    E = 32                            # epoch embedding size
    NUM_CLASSES = 5                   # e.g. sleep stages

    key = jax.random.PRNGKey(0)
    keys = jax.random.split(key, 9)
    x = jax.random.normal(keys[0], (B, L, C, T), dtype=jnp.float32)

    scale = 0.1
    params = {
        # epoch_encoder: Linear(F_IN -> H), ReLU, Linear(H -> E)
        "ew1": scale * jax.random.normal(keys[1], (F_IN, H), jnp.float32),
        "eb1": scale * jax.random.normal(keys[2], (1, H), jnp.float32),
        "ew2": scale * jax.random.normal(keys[3], (H, E), jnp.float32),
        "eb2": scale * jax.random.normal(keys[4], (1, E), jnp.float32),
        # sequence_encoder: Linear(E -> H), tanh, Linear(H -> NUM_CLASSES)
        "sw1": scale * jax.random.normal(keys[5], (E, H), jnp.float32),
        "sb1": scale * jax.random.normal(keys[6], (1, H), jnp.float32),
        "sw2": scale * jax.random.normal(keys[7], (H, NUM_CLASSES), jnp.float32),
        "sb2": scale * jax.random.normal(keys[8], (1, NUM_CLASSES), jnp.float32),
    }

    ref = _reference(x, params, B, L, NUM_CLASSES)

    # --- default path: bf16 operands + bf16 logits (f32 accumulation) ---
    out_bf16 = jax.block_until_ready(seq_to_seq_forward(x, params))
    assert out_bf16.shape == (B, L, NUM_CLASSES)
    assert out_bf16.dtype == jnp.bfloat16
    assert jnp.allclose(out_bf16.astype(jnp.float32), ref, atol=5e-2)

    # --- exact f32 path ---
    out_f32 = jax.block_until_ready(
        seq_to_seq_forward(x, params, compute_dtype=jnp.float32, out_dtype=jnp.float32))
    assert jnp.allclose(out_f32, ref, atol=1e-5, rtol=1e-5)

    # --- non-divisible row count (B*L = 21) exercises the OOB-masked tail block ---
    B2, L2 = 3, 7
    x_odd = jax.random.normal(jax.random.PRNGKey(1), (B2, L2, C, T), jnp.float32)
    out_odd = jax.block_until_ready(
        seq_to_seq_forward(x_odd, params, compute_dtype=jnp.float32, out_dtype=jnp.float32))
    ref_odd = _reference(x_odd, params, B2, L2, NUM_CLASSES)
    assert out_odd.shape == (B2, L2, NUM_CLASSES)
    assert jnp.allclose(out_odd, ref_odd, atol=1e-5, rtol=1e-5)

    print("KERNEL_OK")
</pallas_src>

<mosaic_0001>
module attributes {stable_mosaic.version = 11 : i64} {
  func.func @_fused_seq2seq_kernel(%arg0: i32, %arg1: memref<8x64xf32, #tpu.memory_space<vmem>>, %arg2: memref<64x128xbf16, #tpu.memory_space<vmem>>, %arg3: memref<1x128xf32, #tpu.memory_space<vmem>>, %arg4: memref<128x128xbf16, #tpu.memory_space<vmem>>, %arg5: memref<1x128xf32, #tpu.memory_space<vmem>>, %arg6: memref<128x128xbf16, #tpu.memory_space<vmem>>, %arg7: memref<1x128xf32, #tpu.memory_space<vmem>>, %arg8: memref<128x128xbf16, #tpu.memory_space<vmem>>, %arg9: memref<1x128xf32, #tpu.memory_space<vmem>>, %arg10: memref<8x128xbf16, #tpu.memory_space<vmem>>) attributes {dimension_semantics = [#tpu.dimension_semantics<parallel>], iteration_bounds = array<i64: 2>, scalar_prefetch = 0 : i64, scratch_operands = 0 : i64, tpu.core_type = #tpu.core_type<tc>, window_params = [{transform_indices = @transform_0, window_bounds = array<i64: 8, 64>}, {pipeline_mode = #tpu.pipeline_mode<synchronous>, transform_indices = @transform_1, window_bounds = array<i64: 64, 128>}, {pipeline_mode = #tpu.pipeline_mode<synchronous>, transform_indices = @transform_2, window_bounds = array<i64: 1, 128>}, {pipeline_mode = #tpu.pipeline_mode<synchronous>, transform_indices = @transform_3, window_bounds = array<i64: 128, 128>}, {pipeline_mode = #tpu.pipeline_mode<synchronous>, transform_indices = @transform_4, window_bounds = array<i64: 1, 128>}, {pipeline_mode = #tpu.pipeline_mode<synchronous>, transform_indices = @transform_5, window_bounds = array<i64: 128, 128>}, {pipeline_mode = #tpu.pipeline_mode<synchronous>, transform_indices = @transform_6, window_bounds = array<i64: 1, 128>}, {pipeline_mode = #tpu.pipeline_mode<synchronous>, transform_indices = @transform_7, window_bounds = array<i64: 128, 128>}, {pipeline_mode = #tpu.pipeline_mode<synchronous>, transform_indices = @transform_8, window_bounds = array<i64: 1, 128>}, {transform_indices = @transform_9, window_bounds = array<i64: 8, 128>}]} {
    %c0 = arith.constant 0 : index
    %c0_0 = arith.constant 0 : index
    %0 = vector.load %arg1[%c0, %c0_0] : memref<8x64xf32, #tpu.memory_space<vmem>>, vector<8x64xf32>
    %1 = arith.truncf %0 : vector<8x64xf32> to vector<8x64xbf16>
    %c0_1 = arith.constant 0 : index
    %c0_2 = arith.constant 0 : index
    %2 = vector.load %arg2[%c0_1, %c0_2] : memref<64x128xbf16, #tpu.memory_space<vmem>>, vector<64x128xbf16>
    %cst = arith.constant dense<0.000000e+00> : vector<8x128xf32>
    %3 = tpu.matmul %1, %2, %cst {dimension_numbers = #tpu.dot_dimension_numbers<[1], [0], [0], [1], [0, 0, 1, 1], [], []>} : vector<8x64xbf16>, vector<64x128xbf16>, vector<8x128xf32> -> vector<8x128xf32>
    %c0_3 = arith.constant 0 : index
    %c0_4 = arith.constant 0 : index
    %4 = vector.load %arg3[%c0_3, %c0_4] : memref<1x128xf32, #tpu.memory_space<vmem>>, vector<1x128xf32>
    %5 = vector.broadcast %4 : vector<1x128xf32> to vector<8x128xf32>
    %6 = arith.addf %3, %5 : vector<8x128xf32>
    %cst_5 = arith.constant 0.000000e+00 : f32
    %7 = vector.broadcast %cst_5 : f32 to vector<8x128xf32>
    %8 = arith.maximumf %6, %7 : vector<8x128xf32>
    %9 = arith.truncf %8 : vector<8x128xf32> to vector<8x128xbf16>
    %c0_6 = arith.constant 0 : index
    %c0_7 = arith.constant 0 : index
    %10 = vector.load %arg4[%c0_6, %c0_7] : memref<128x128xbf16, #tpu.memory_space<vmem>>, vector<128x128xbf16>
    %cst_8 = arith.constant dense<0.000000e+00> : vector<8x128xf32>
    %11 = tpu.matmul %9, %10, %cst_8 {dimension_numbers = #tpu.dot_dimension_numbers<[1], [0], [0], [1], [0, 0, 1, 1], [], []>} : vector<8x128xbf16>, vector<128x128xbf16>, vector<8x128xf32> -> vector<8x128xf32>
    %c0_9 = arith.constant 0 : index
    %c0_10 = arith.constant 0 : index
    %12 = vector.load %arg5[%c0_9, %c0_10] : memref<1x128xf32, #tpu.memory_space<vmem>>, vector<1x128xf32>
    %13 = vector.broadcast %12 : vector<1x128xf32> to vector<8x128xf32>
    %14 = arith.addf %11, %13 : vector<8x128xf32>
    %15 = arith.truncf %14 : vector<8x128xf32> to vector<8x128xbf16>
    %c0_11 = arith.constant 0 : index
    %c0_12 = arith.constant 0 : index
    %16 = vector.load %arg6[%c0_11, %c0_12] : memref<128x128xbf16, #tpu.memory_space<vmem>>, vector<128x128xbf16>
    %cst_13 = arith.constant dense<0.000000e+00> : vector<8x128xf32>
    %17 = tpu.matmul %15, %16, %cst_13 {dimension_numbers = #tpu.dot_dimension_numbers<[1], [0], [0], [1], [0, 0, 1, 1], [], []>} : vector<8x128xbf16>, vector<128x128xbf16>, vector<8x128xf32> -> vector<8x128xf32>
    %c0_14 = arith.constant 0 : index
    %c0_15 = arith.constant 0 : index
    %18 = vector.load %arg7[%c0_14, %c0_15] : memref<1x128xf32, #tpu.memory_space<vmem>>, vector<1x128xf32>
    %19 = vector.broadcast %18 : vector<1x128xf32> to vector<8x128xf32>
    %20 = arith.addf %17, %19 : vector<8x128xf32>
    %21 = math.tanh %20 : vector<8x128xf32>
    %22 = arith.truncf %21 : vector<8x128xf32> to vector<8x128xbf16>
    %c0_16 = arith.constant 0 : index
    %c0_17 = arith.constant 0 : index
    %23 = vector.load %arg8[%c0_16, %c0_17] : memref<128x128xbf16, #tpu.memory_space<vmem>>, vector<128x128xbf16>
    %cst_18 = arith.constant dense<0.000000e+00> : vector<8x128xf32>
    %24 = tpu.matmul %22, %23, %cst_18 {dimension_numbers = #tpu.dot_dimension_numbers<[1], [0], [0], [1], [0, 0, 1, 1], [], []>} : vector<8x128xbf16>, vector<128x128xbf16>, vector<8x128xf32> -> vector<8x128xf32>
    %c0_19 = arith.constant 0 : index
    %c0_20 = arith.constant 0 : index
    %25 = vector.load %arg9[%c0_19, %c0_20] : memref<1x128xf32, #tpu.memory_space<vmem>>, vector<1x128xf32>
    %26 = vector.broadcast %25 : vector<1x128xf32> to vector<8x128xf32>
    %27 = arith.addf %24, %26 : vector<8x128xf32>
    %28 = arith.truncf %27 : vector<8x128xf32> to vector<8x128xbf16>
    %c0_21 = arith.constant 0 : index
    %c0_22 = arith.constant 0 : index
    %29 = vector.load %arg10[%c0_21, %c0_22] : memref<8x128xbf16, #tpu.memory_space<vmem>>, vector<8x128xbf16>
    tpu.vector_store %arg10[%c0_21, %c0_22], %28 {strides = array<i32>} : memref<8x128xbf16, #tpu.memory_space<vmem>>, vector<8x128xbf16>,
    return
  }
  func.func @transform_0(%arg0: i32) -> (i32, i32) {
    %c0_i32 = arith.constant 0 : i32
    %c0_i32_0 = arith.constant 0 : i32
    return %arg0, %c0_i32 : i32, i32
  }
  func.func @transform_1(%arg0: i32) -> (i32, i32) {
    %c0_i32 = arith.constant 0 : i32
    %c0_i32_0 = arith.constant 0 : i32
    %c0_i32_1 = arith.constant 0 : i32
    return %c0_i32, %c0_i32_0 : i32, i32
  }
  func.func @transform_2(%arg0: i32) -> (i32, i32) {
    %c0_i32 = arith.constant 0 : i32
    %c0_i32_0 = arith.constant 0 : i32
    %c0_i32_1 = arith.constant 0 : i32
    return %c0_i32, %c0_i32_0 : i32, i32
  }
  func.func @transform_3(%arg0: i32) -> (i32, i32) {
    %c0_i32 = arith.constant 0 : i32
    %c0_i32_0 = arith.constant 0 : i32
    %c0_i32_1 = arith.constant 0 : i32
    return %c0_i32, %c0_i32_0 : i32, i32
  }
  func.func @transform_4(%arg0: i32) -> (i32, i32) {
    %c0_i32 = arith.constant 0 : i32
    %c0_i32_0 = arith.constant 0 : i32
    %c0_i32_1 = arith.constant 0 : i32
    return %c0_i32, %c0_i32_0 : i32, i32
  }
  func.func @transform_5(%arg0: i32) -> (i32, i32) {
    %c0_i32 = arith.constant 0 : i32
    %c0_i32_0 = arith.constant 0 : i32
    %c0_i32_1 = arith.constant 0 : i32
    return %c0_i32, %c0_i32_0 : i32, i32
  }
  func.func @transform_6(%arg0: i32) -> (i32, i32) {
    %c0_i32 = arith.constant 0 : i32
    %c0_i32_0 = arith.constant 0 : i32
    %c0_i32_1 = arith.constant 0 : i32
    return %c0_i32, %c0_i32_0 : i32, i32
  }
  func.func @transform_7(%arg0: i32) -> (i32, i32) {
    %c0_i32 = arith.constant 0 : i32
    %c0_i32_0 = arith.constant 0 : i32
    %c0_i32_1 = arith.constant 0 : i32
    return %c0_i32, %c0_i32_0 : i32, i32
  }
  func.func @transform_8(%arg0: i32) -> (i32, i32) {
    %c0_i32 = arith.constant 0 : i32
    %c0_i32_0 = arith.constant 0 : i32
    %c0_i32_1 = arith.constant 0 : i32
    return %c0_i32, %c0_i32_0 : i32, i32
  }
  func.func @transform_9(%arg0: i32) -> (i32, i32) {
    %c0_i32 = arith.constant 0 : i32
    %c0_i32_0 = arith.constant 0 : i32
    return %arg0, %c0_i32 : i32, i32
  }
}

</mosaic_0001>

<bundles_post_ra>
// kernel: tpu_custom_call.1
= control target key start
LH: loop header
LB: loop body
LE: loop exit
PB: predicated region body
PF: predicated region fallthrough
CT: control target
= control target key end

     0   :  { %s1564_s0 = inlined_call_operand.hbm [shape: f32[16,64], index: 0, kind: input, shape index: {}]   ;;  %s1565_s1 = inlined_call_operand.hbm [shape: bf16[64,128], index: 1, kind: input, shape index: {}]   ;;  %s1566_s2 = inlined_call_operand.vmem [shape: f32[1,128], index: 2, kind: input, shape index: {}]   ;;  %s1567_s3 = inlined_call_operand.hbm [shape: bf16[128,128], index: 3, kind: input, shape index: {}]   ;;  %s1568_s4 = inlined_call_operand.vmem [shape: f32[1,128], index: 4, kind: input, shape index: {}]   ;;  %s1569_s5 = inlined_call_operand.hbm [shape: bf16[128,128], index: 5, kind: input, shape index: {}]   ;;  %s1570_s6 = inlined_call_operand.vmem [shape: f32[1,128], index: 6, kind: input, shape index: {}]   ;;  %s1571_s7 = inlined_call_operand.hbm [shape: bf16[128,128], index: 7, kind: input, shape index: {}]   ;;  %s1572_s8 = inlined_call_operand.vmem [shape: f32[1,128], index: 8, kind: input, shape index: {}]   ;;  %s1573_s9 = inlined_call_operand.hbm [shape: bf16[16,128], index: 9, kind: output, shape index: {}]  }
   0x1   :  { %1574 = sst [smem:[#allocation16_spill]] %s1565_s1 }
   0x2   :  { %1575 = sst [smem:[#allocation17_spill]] %s1567_s3 }
   0x3   :  { %1576 = sst [smem:[#allocation18_spill]] %s1569_s5 }
   0x4   :  { %1577 = sst [smem:[#allocation19_spill]] %s1571_s7 }
   0x5   :  { %14 = vsyncpa [#allocation3], 0 }
   0x6   :  { %16 = vsyncpa [#allocation3 + $0x1], 0 }
   0x7   :  { %17 = vsyncpa [#allocation6], 0 }
   0x8   :  { %18 = vsyncpa [#allocation9], 0 }
   0x9   :  { %19 = vsyncpa [#allocation4], 0 }
   0xa   :  { %21 = vsyncpa [#allocation4 + $0x1], 0  ;;  %s1384_s30 = smov 0   ;;  %s1386_s10 = smov 0  }
   0xb   :  { %s1388_s11 = smov 0   ;;  %s1390_s12 = smov 0  }
   0xc LB: > { %s1578_s1 = sld [smem:[#allocation16_spill]]  ;;  %s1408_s16 = sadd.s32 4294967295, %s1326_s12   ;;  %s1326_s12 = sphi %s1390_s12, %s1593_s12   ;;  %s1322_s11 = sphi %s1388_s11, %s1592_s11   ;;  %s1318_s10 = sphi %s1386_s10, %s1591_s10   ;;  %s1314_s30 = sphi %s1384_s30, %s1590_s30  }
   0xd   : > { %p847_p0 = scmp.ge.s32.totalorder %s1326_s12, 1  ;;  %p48_p1 = scmp.eq.s32.totalorder %s1408_s16, 0 }
   0xe   : > { %p252_p2 = scmp.lt.s32.totalorder %s1326_s12, 3  ;;  %s1328_s18 = smov [#allocation5]  }
   0xf   : > { %s265_s19 = sshll.u32 %s1328_s18, 4  ;;  %s1580_s5 = sld [smem:[#allocation18_spill]]  ;;  %s266_s19 = int_to_ptr.vmem [resolvable:$true] %s265_s19 }
  0x10   : > { %p1413_p3 = pnand %p847_p0, %p252_p2  ;;  %s1582_s3 = sld [smem:[#allocation17_spill]] }
  0x11   : > { %s1329_s27 = smov [#allocation8]   ;;  %s1330_s29 = smov 64  }
  0x12   : > { %s263_s15 = sshll.u32 %s1578_s1, 4  ;;  %p1027_p4 = pneg %p1413_p3  ;;  %s264_s15 = int_to_ptr.hbm [resolvable:$true] %s263_s15 }
  0x13   : > { %s299_s28 = sshll.u32 %s1329_s27, 4  ;;  %s1331_s13 = smov 4   ;;  %s300_s28 = int_to_ptr.vmem [resolvable:$true] %s299_s28 }
  0x14   : > { %p1425_p6 = pnand %p1027_p4, %p48_p1  ;;  %s1583_s7 = sld [smem:[#allocation19_spill]] }
  0x15   : > { %s297_s22 = sshll.u32 %s1580_s5, 4  ;;  %s1332_s21 = smov [#allocation7]   ;;  %s298_s22 = int_to_ptr.hbm [resolvable:$true] %s297_s22 }
  0x16   : > { %s280_s26 = sshll.u32 %s1582_s3, 4  ;;  %s282_s24 = sshll.u32 %s1332_s21, 4  ;;  %s281_s26 = int_to_ptr.hbm [resolvable:$true] %s280_s26  ;;  %s283_s24 = int_to_ptr.vmem [resolvable:$true] %s282_s24 }
  0x17   : > { %1030 = dma.hbm_to_vmem [thread:$0]  (!%p1425_p6), %s264_s15, 512, %s266_s19, [#allocation6], %s1330_s29, %s1330_s29, %s1331_s13  }
  0x18   : > { %1036 = dma.hbm_to_vmem [thread:$0]  (!%p1425_p6), %s298_s22, 1024, %s300_s28, [#allocation9], %s1330_s29, %s1330_s29, %s1331_s13  }
  0x19   : > { %1033 = dma.hbm_to_vmem [thread:$0]  (!%p1425_p6), %s281_s26, 1024, %s283_s24, [#allocation6], %s1330_s29, %s1330_s29, %s1331_s13  }
  0x1a   : > { %s314_s20 = sshll.u32 %s1583_s7, 4  ;;  %s1333_s15 = smov [#allocation10]   ;;  %s315_s20 = int_to_ptr.hbm [resolvable:$true] %s314_s20 }
  0x1b   : > { %s316_s19 = sshll.u32 %s1333_s15, 4  ;;  %s846_s22 = sadd.s32 4294967294, %s1326_s12   ;;  %s317_s19 = int_to_ptr.vmem [resolvable:$true] %s316_s19 }
  0x1c   : > { %1039 = dma.hbm_to_vmem [thread:$0]  (!%p1425_p6), %s315_s20, 1024, %s317_s19, [#allocation9], %s1330_s29, %s1330_s29, %s1331_s13  }
  0x1d   : > { %s1445_s25 = sadd.s32 1, %s1326_s12   ;;  %s34_s28 = sadd.s32 1, %s1322_s11 }
  0x1e   : > { %s31_s27 = ssub.s32 %s1326_s12, %s1445_s25  ;;  %p41_p8 = scmp.ne.s32.totalorder %s1322_s11, %s1318_s10 }
  0x1f   : > { %p32_p7 = scmp.eq.s32.totalorder %s31_s27, 0  ;;  %p42_p9 = scmp.eq.s32.totalorder %s1326_s12, 0 }
  0x20   : > { %p47_p10 = scmp.ne.s32.totalorder %s1318_s10, %s1314_s30  ;;  %p239_p13 = scmp.eq.s32.totalorder %s1408_s16, 1 }
  0x21   : > { %s1456_s26 = scalar_select %p32_p7, %s1322_s11, %s34_s28  }
  0x22   : > { %p1458_p11 = por %p42_p9, %p41_p8  ;;  %p1464_p12 = por %p48_p1, %p47_p10 }
  0x23   : > { %p245_p0 = scmp.eq.s32.totalorder %s846_s22, 1  ;;  %p1052_p2 = scmp.lt.s32.totalorder %s1326_s12, 2 }
  0x24   : > { %s333_s29 = sand.u32 1, %s1322_s11   ;;  %p1471_p4 = por %p239_p13, %p41_p8 }
  0x25   : > { %p1475_p6 = por %p245_p0, %p47_p10  ;;  %s853_s20 = sshll.u32 %s333_s29, 3 }
  0x26   : > { %s854_s21 = sshll.u32 %s1326_s12, 3  ;;  %s337_s27 = scalar_lea.vmem [#allocation2], %s853_s20 }
  0x27   : > { %s341_s19 = scalar_lea.hbm %s1564_s0, %s854_s21  ;;  %s345_s28 = sshll.u32 %s337_s27, 4  ;;  %s346_s28 = int_to_ptr.vmem [resolvable:$true] %s345_s28 }
  0x28   : > { %s343_s1 = sshll.u32 %s341_s19, 4  ;;  %p1485_p7 = pnand %p1052_p2, %p1458_p11  ;;  %s344_s1 = int_to_ptr.hbm [resolvable:$true] %s343_s1 }
  0x29   : > { %s334_s3 = scalar_lea.sflag [#allocation3], %s333_s29  ;;  %s1222_s5 = sshra.s32 %s344_s1, 4  ;;  %s1223_s5 = int_to_ptr.hbm [resolvable:$true] %s1222_s5 }
  0x2a   : > { %s1224_s7 = scalar_lea.hbm %s1223_s5, 8  ;;  %p1226_p9 = pneg %p1485_p7 }
  0x2b   : > { %p1225_p8 = scmp.ne.s32.totalorder %s1223_s5, %s1224_s7  ;;  %s1229_s24 = scalar_lea.hbm %s1564_s0, 16 }
  0x2c   : > { %p1230_p11 = scmp.lt.s32.totalorder %s1223_s5, %s1564_s0  ;;  %p1231_p0 = scmp.lt.s32.totalorder %s1229_s24, %s1224_s7 }
  0x2d   : > { %p1227_p10 = pnand %p1226_p9, %p1225_p8 }
  0x2e   : > { %p1232_p2 = por %p1231_p0, %p1230_p11 }
  0x2f   : > { %p1228_p13 = pneg %p1227_p10 }
  0x31   : > { %p1233_p5 = pnand %p1232_p2, %p1228_p13 }
  0x33   : > { %1236 = shalt.err (!%p1233_p5)
}
  0x34   : > { %1043 = dma.hbm_to_vmem [thread:$0]  (!%p1485_p7), %s344_s1, 128, %s346_s28, %s334_s3  }
  0x35   : > { %354 = sbr.rel (%p1413_p3) target bundleno = 624 (0x270), region = 56  ;;  %s1502_s29 = sand.u32 (!%p1413_p3), 1, %s1318_s10  }
  0x36   : > { %s856_s19 = sshll.u32 (!%p1413_p3), %s1502_s29, 3  ;;  %s357_s27 = scalar_lea.sflag (!%p1413_p3), [#allocation3], %s1502_s29 }
  0x37   : > { %s360_s20 = scalar_lea.vmem (!%p1413_p3), [#allocation2], %s856_s19 }
  0x3a   : > { %1297 = dma.done.wait (%p1464_p12), %s357_s27, 128  }
  0x3b   : > { %1299 = vsyncadd (%p1464_p12), %s357_s27, 4294967168 }
  0x3c   : > { %1301 = dma.done.wait (%p48_p1), [#allocation6], 1536  }
  0x3d   : > { %1303 = vsyncadd (%p48_p1), [#allocation6], 4294965760 }
  0x3e   : > { %1305 = dma.done.wait (%p48_p1), [#allocation9], 2048  }
  0x3f   : > { %1307 = vsyncadd (%p48_p1), [#allocation9], 4294965248  ;;  %v982_v0 = vld [vmem:[#allocation5 + $0x18] sm:$0xff]  ;;  %v981_v2 = vld [vmem:[#allocation5 + $0x10] sm:$0xff]  ;;  %vm455_vm0 = vcmask 523264   ;;  %s861_s28 = sshll.u32 %s1502_s29, 2 }
  0x40   : > { %v990_v1 = vld [vmem:[#allocation7 + $0x38] sm:$0xff]  ;;  %463 = vmatpush.bf16.msra.mxu0 %v982_v0  ;;  %v989_v3 = vld [vmem:[#allocation7 + $0x30] sm:$0xff]  ;;  %v980_v4 = vld [vmem:[#allocation5 + $0x8] sm:$0xff]  ;;  %s976_s22 = sshll.u32 %s1408_s16, 2  ;;  %s415_s27 = scalar_lea.vmem [#allocation11], %s861_s28 }
  0x41   : > { %542 = vmatpush.bf16.msra.mxu1 %v990_v1  ;;  %v988_v5 = vld [vmem:[#allocation7 + $0x28] sm:$0xff]  ;;  %v979_v6 = vld [vmem:[#allocation5] sm:$0xff]  ;;  %v417_v7 = vld [vmem:[%s360_s20] sm:$0xff]  ;;  %s733_s19 = scalar_lea.hbm %s1573_s9, %s976_s22  ;;  %s735_s20 = sshll.u32 %s415_s27, 4  ;;  %s736_s20 = int_to_ptr.vmem [resolvable:$true] %s735_s20 }
  0x42   : > { %v987_v8 = vld [vmem:[#allocation7 + $0x20] sm:$0xff]  ;;  %v418_v9 = vpack.c.bf16 %v417_v7, %v417_v7  ;;  %v986_v10 = vld [vmem:[#allocation7 + $0x18] sm:$0xff]  ;;  %v985_v11 = vld [vmem:[#allocation7 + $0x10] sm:$0xff]  ;;  %s737_s1 = sshll.u32 %s733_s19, 4  ;;  %s723_s3 = scalar_lea.sflag [#allocation4], %s1502_s29  ;;  %s738_s1 = int_to_ptr.hbm [resolvable:$true] %s737_s1 }
  0x43   : > { %v984_v12 = vld [vmem:[#allocation7 + $0x8] sm:$0xff]  ;;  %v983_v13 = vld [vmem:[#allocation7] sm:$0xff]  ;;  %v998_v14 = vld [vmem:[#allocation8 + $0x38] sm:$0xff]  ;;  %s1266_s16 = sshra.s32 %s738_s1, 4  ;;  %s1272_s23 = scalar_lea.hbm %s1573_s9, 8  ;;  %s1267_s16 = int_to_ptr.hbm [resolvable:$true] %s1266_s16 }
  0x44   : > { %464 = vmatpush.bf16.msra.mxu0 %v981_v2  ;;  %624 = vmatpush.bf16.msra.mxu2 %v998_v14  ;;  %v997_v15 = vld [vmem:[#allocation8 + $0x30] sm:$0xff]  ;;  %v996_v16 = vld [vmem:[#allocation8 + $0x28] sm:$0xff]  ;;  %v995_v17 = vld [vmem:[#allocation8 + $0x20] sm:$0xff]  ;;  %s1268_s5 = scalar_lea.hbm %s1267_s16, 4  ;;  %p1273_p12 = scmp.lt.s32.totalorder %s1267_s16, %s1573_s9 }
  0x45   : > { %543 = vmatpush.bf16.msra.mxu1 %v989_v3  ;;  %v994_v18 = vld [vmem:[#allocation8 + $0x18] sm:$0xff]  ;;  %v993_v19 = vld [vmem:[#allocation8 + $0x10] sm:$0xff]  ;;  %v992_v21 = vld [vmem:[#allocation8 + $0x8] sm:$0xff]  ;;  %p1269_p1 = scmp.ne.s32.totalorder %s1267_s16, %s1268_s5  ;;  %p1274_p7 = scmp.lt.s32.totalorder %s1272_s23, %s1268_s5 }
  0x46   : > { %v1096_v20 = vld [vmem:[%s1566_s2] ss:$0 sm:$0xff]  ;;  %v991_v27 = vld [vmem:[#allocation8] sm:$0xff]  ;;  %v1006_v28 = vld [vmem:[#allocation10 + $0x38] sm:$0xff] }
  0x47   : > { %707 = vmatpush.bf16.msra.mxu3 %v1006_v28  ;;  %v1005_v29 = vld [vmem:[#allocation10 + $0x30] sm:$0xff]  ;;  %v1004_v30 = vld [vmem:[#allocation10 + $0x28] sm:$0xff]  ;;  %v1003_v31 = vld [vmem:[#allocation10 + $0x20] sm:$0xff]  ;;  %p1270_p3 = pnand %p1269_p1, %p1471_p4  ;;  %p1275_p8 = por %p1274_p7, %p1273_p12 }
  0x48   : > { %465 = vmatpush.bf16.msra.mxu0 %v980_v4  ;;  %625 = vmatpush.bf16.msra.mxu2 %v997_v15  ;;  %v1002_v32 = vld [vmem:[#allocation10 + $0x18] sm:$0xff]  ;;  %v1097_v33 = vld [vmem:[%s1568_s4] ss:$0 sm:$0xff]  ;;  %v1000_v39 = vld [vmem:[#allocation10 + $0x8] sm:$0xff] }
  0x49   : > { %544 = vmatpush.bf16.msra.mxu1 %v988_v5  ;;  %v1001_v38 = vld [vmem:[#allocation10 + $0x10] sm:$0xff]  ;;  %v999_v40 = vld [vmem:[#allocation10] sm:$0xff]  ;;  %p1271_p5 = pneg %p1270_p3 }
  0x4a   : > { %v1098_v41 = vld [vmem:[%s1570_s6] ss:$0 sm:$0xff] }
  0x4b   : > { %708 = vmatpush.bf16.msra.mxu3 %v1005_v29  ;;  %v1099_v47 = vld [vmem:[%s1572_s8] ss:$0 sm:$0xff]  ;;  %p1276_p9 = pnand %p1275_p8, %p1271_p5 }
  0x4c   : > { %466 = vmatpush.bf16.msra.mxu0 %v979_v6  ;;  %626 = vmatpush.bf16.msra.mxu2 %v996_v16 }
  0x4d   : > { %545 = vmatpush.bf16.msra.mxu1 %v987_v8 }
  0x4f   : > { %878 = vmatmul.msk.bf16.vlgmr.msra.gmra.mxu0 %vm455_vm0, %v418_v9  ;;  %709 = vmatpush.bf16.msra.mxu3 %v1004_v30 }
  0x50   : > { %627 = vmatpush.bf16.msra.mxu2 %v995_v17 }
  0x51   : > { %546 = vmatpush.bf16.msra.mxu1 %v986_v10 }
  0x53   : > { %710 = vmatpush.bf16.msra.mxu3 %v1003_v31 }
  0x54   : > { %628 = vmatpush.bf16.msra.mxu2 %v994_v18 }
  0x55   : > { %547 = vmatpush.bf16.msra.mxu1 %v985_v11 }
  0x57   : > { %711 = vmatpush.bf16.msra.mxu3 %v1002_v32 }
  0x58   : > { %629 = vmatpush.bf16.msra.mxu2 %v993_v19 }
  0x59   : > { %548 = vmatpush.bf16.msra.mxu1 %v984_v12 }
  0x5b   : > { %712 = vmatpush.bf16.msra.mxu3 %v1001_v38 }
  0x5c   : > { %630 = vmatpush.bf16.msra.mxu2 %v992_v21 }
  0x5d   : > { %549 = vmatpush.bf16.msra.mxu1 %v983_v13 }
  0x5f   : > { %713 = vmatpush.bf16.msra.mxu3 %v1000_v39 }
  0x60   : > { %631 = vmatpush.bf16.msra.mxu2 %v991_v27 }
  0x63   : > { %714 = vmatpush.bf16.msra.mxu3 %v999_v40 }
  0xcc   : > { %v468_v22 = vpop.f32.mrf.mxu0 }
  0xcd   : > { %v469_v23 = vadd.f32 %v1096_v20, %v468_v22 }
  0xcf   : > { %v472_v24 = vmax.f32 %v469_v23, 0.0 }
  0xd1   : > { %v473_v25 = vpack.c.bf16 %v472_v24, %v472_v24 }
  0xd3   : > { %550 = vmatmul.bf16.vlgmr.msra.gmra.mxu1 %v473_v25 }
  0xd4   : > { %v470_v26 = vpop.f32.mrf.mxu0 }
 0x150   : > { %v551_v34 = vpop.f32.mrf.mxu1 }
 0x151   : > { %v552_v35 = vadd.f32 %v1097_v33, %v551_v34 }
 0x153   : > { %v555_v36 = vpack.c.bf16 %v552_v35, %v552_v35 }
 0x155   : > { %632 = vmatmul.bf16.vlgmr.msra.gmra.mxu2 %v555_v36 }
 0x158   : > { %v553_v37 = vpop.f32.mrf.mxu1 }
 0x1d8   : > { %v633_v42 = vpop.f32.mrf.mxu2 }
 0x1d9   : > { %v634_v43 = vadd.f32 %v1098_v41, %v633_v42 }
 0x1db   : > { %1100 = vtanh.f32 %v634_v43 }
 0x1e0   : > { %v635_v44 = vpop.f32.mrf.mxu2 }
 0x1e1   : > { %v1101_v45 = vpop.eup %1100 }
 0x1e2   : > { %v638_v46 = vpack.c.bf16 %v1101_v45, %v1101_v45 }
 0x1e4   : > { %715 = vmatmul.bf16.vlgmr.msra.gmra.mxu3 %v638_v46 }
 0x267   : > { %v716_v48 = vpop.f32.mrf.mxu3 }
 0x268   : > { %v717_v49 = vadd.f32 %v1099_v47, %v716_v48 }
 0x26a   : > { %v720_v50 = vpack.c.bf16 %v717_v49, %v717_v49 }
 0x26c   : > { %721 = vst [vmem:[%s415_s27] sm:$0xf] %v720_v50 }
 0x26d   : > { %1279 = shalt.err (!%p1276_p9)
}
 0x26e   : > { %1025 = dma.vmem_to_hbm [thread:$0]  (%p1471_p4), %s736_s20, 64, %s738_s1, %s723_s3  }
 0x26f   : > { %v718_v51 = vpop.f32.mrf.mxu3 }
 0x270 PF: > { %s749_s29 = sand.u32 1, %s1314_s30   ;;  %p1589_p10 = scmp.ge.s32.totalorder %s1326_s12, 2 }
 0x271   : > { %s750_s21 = scalar_lea.sflag [#allocation4], %s749_s29 }
 0x272   : > { %p1045_p13 = pnand %p1589_p10, %p1475_p6 }
 0x274   : > { %p1046_p11 = pneg %p1045_p13 }
 0x276   : > { %1309 = dma.done.wait (%p1046_p11), %s750_s21, 64  }
 0x277   : > { %1311 = vsyncadd (%p1046_p11), %s750_s21, 4294967232  ;;  %p24_p0 = scmp.ge.s32.totalorder %s1445_s25, 4   ;;  %s1590_s30 = smov %s1318_s10 }
 0x278   : > { %s1591_s10 = smov %s1322_s11  ;;  %s1592_s11 = smov %s1456_s26 }
 0x279   : > { %s1593_s12 = smov %s1445_s25  ;;  %26 = sbr.rel (!%p24_p0) target bundleno = 12 (0xc), region = 117 }
 0x27e   :  { %756 = vsyncpa [#allocation3], 1 }
 0x27f   :  { %758 = vsyncpa [#allocation3 + $0x1], 1 }
 0x280   :  { %759 = vsyncpa [#allocation6], 1 }
 0x281   :  { %760 = vsyncpa [#allocation9], 1 }
 0x282   :  { %761 = vsyncpa [#allocation4], 1 }
 0x283   :  { %763 = vsyncpa [#allocation4 + $0x1], 1 }

</bundles_post_ra>
